<compile_context>
chip_gen: v7x
topology: tpu7x:2x2x1
jax: 0.10.0
libtpu: 0.0.40
codegen_flags: <defaults>
</compile_context>

<pallas_src>
import jax
import jax.numpy as jnp
from jax.experimental import pallas as pl
from jax.experimental.pallas import tpu as pltpu


def cfg_denoiser_kernel(weff_ref, beff_ref, x_ref, out_ref):
    """One (C, S, 128) block of one batch sample.

    Scalar-prefetch (SMEM) refs:
      weff_ref : (B*C*C,) flat effective channel-mix weights  Weff[b, ci, co]
      beff_ref : (B*C,)   flat effective bias                 Beff[b, co]
    VMEM refs:
      x_ref    : (C, S, 128)  input channel planes (full vregs)
      out_ref  : (C, S, 128)  CFG-combined denoised output
    """
    b = pl.program_id(0)
    n_ch = x_ref.shape[0]
    w_base = b * n_ch * n_ch
    b_base = b * n_ch

    # Load each full (S, 128) channel plane once.
    xs = [x_ref[ci] for ci in range(n_ch)]

    for co in range(n_ch):
        acc = xs[0] * weff_ref[w_base + co]
        for ci in range(1, n_ch):
            acc = acc + xs[ci] * weff_ref[w_base + ci * n_ch + co]
        out_ref[co] = (acc + beff_ref[b_base + co]).astype(out_ref.dtype)


def _round_up(n, m):
    return ((n + m - 1) // m) * m


def cfg_denoiser_for_glid(x, sigma, cond_scale, w, bias,
                          gamma_c, beta_c, gamma_u, beta_u, *, max_sublanes=512):
    """x: [B, C, H, W] f32, sigma: [B] f32, cond_scale: python/0-d scalar.

    Returns the CFG-guided denoised output, [B, C, H, W] f32.
    """
    B, C, H, W = x.shape
    HW = H * W

    # ---- fold sigma scale, FiLM (cond & uncond) and cond_scale into per-sample
    # ---- effective weights / bias (tiny arrays; scalar-prefetched to SMEM).
    sig = sigma.astype(jnp.float32)
    s = 1.0 / jnp.sqrt(sig * sig + 1.0)                               # (B,)
    cs = jnp.float32(cond_scale)
    gu = gamma_u.astype(jnp.float32)
    bu = beta_u.astype(jnp.float32)
    gc = gamma_c.astype(jnp.float32)
    bc = beta_c.astype(jnp.float32)
    wf = w.astype(jnp.float32)
    bf = bias.astype(jnp.float32)

    G = (1.0 + gu)[None, :] + (gc - gu[None, :]) * cs                 # (B, C)
    weff = wf[None, :, :] * s[:, None, None] * G[:, None, :]          # (B, Ci, Co)
    beff = bf[None, :] * G + bu[None, :] + (bc - bu[None, :]) * cs    # (B, C)
    weff_flat = weff.reshape(-1)                                      # (B*C*C,)
    beff_flat = beff.reshape(-1)                                      # (B*C,)

    # ---- lane-dense, full-vreg tiling: (B, C, R_pad, 128) with S | R_pad, 8 | S.
    r_needed = -(-HW // 128)                       # ceil(HW / 128)
    S = min(max_sublanes, _round_up(r_needed, 8))  # multiple of 8, ~1 MiB/block cap
    r_pad = _round_up(r_needed, S)
    hw_pad = r_pad * 128

    x3 = x.astype(jnp.float32).reshape(B, C, HW)
    if hw_pad != HW:
        x3 = jnp.pad(x3, ((0, 0), (0, 0), (0, hw_pad - HW)))
    x4 = x3.reshape(B, C, r_pad, 128)

    grid = (B, r_pad // S)
    block = pl.BlockSpec((None, C, S, 128), lambda b, r, *_: (b, 0, r, 0))

    out4 = pl.pallas_call(
        cfg_denoiser_kernel,
        out_shape=jax.ShapeDtypeStruct((B, C, r_pad, 128), jnp.float32),
        grid_spec=pltpu.PrefetchScalarGridSpec(
            num_scalar_prefetch=2,
            grid=grid,
            in_specs=[block],                      # only x streams from HBM
            out_specs=block,
        ),
        compiler_params=pltpu.CompilerParams(
            dimension_semantics=("parallel", "parallel"),
            vmem_limit_bytes=64 << 20),
    )(weff_flat, beff_flat, x4)

    out3 = out4.reshape(B, C, hw_pad)[:, :, :HW]
    return out3.reshape(B, C, H, W)


# ---------------------------------------------------------------------------
# Plain-JAX reference mirroring the literal PyTorch forward (cat -> inner_model
# on the doubled batch -> chunk -> CFG combine).
# ---------------------------------------------------------------------------
def _inner_model_ref(x_in, sigma_in, gamma_in, beta_in, w, bias):
    s = 1.0 / jnp.sqrt(sigma_in ** 2 + 1.0)                            # (2B,)
    h = jnp.einsum('bchw,cd->bdhw', x_in, w) * s[:, None, None, None] \
        + bias[None, :, None, None]
    return h * (1.0 + gamma_in[:, :, None, None]) + beta_in[:, :, None, None]


def _reference(x, sigma, cond_scale, w, bias, gamma_c, beta_c, gamma_u, beta_u):
    B, C = x.shape[0], x.shape[1]
    x_in = jnp.concatenate([x, x], axis=0)
    sigma_in = jnp.concatenate([sigma, sigma], axis=0)
    gamma_in = jnp.concatenate(
        [gamma_c, jnp.broadcast_to(gamma_u[None, :], (B, C))], axis=0)
    beta_in = jnp.concatenate(
        [beta_c, jnp.broadcast_to(beta_u[None, :], (B, C))], axis=0)
    den = _inner_model_ref(x_in, sigma_in, gamma_in, beta_in, w, bias)
    cond, uncond = den[:B], den[B:]
    return uncond + (cond - uncond) * cond_scale


if __name__ == "__main__":
    key = jax.random.PRNGKey(0)
    kx, ks, kw, kb, kgc, kbc, kgu, kbu = jax.random.split(key, 8)

    B, C, H, W = 2, 4, 16, 16
    x = jax.random.normal(kx, (B, C, H, W), dtype=jnp.float32)
    sigma = jax.random.uniform(ks, (B,), dtype=jnp.float32, minval=0.1, maxval=2.0)
    cond_scale = 3.0

    w = jax.random.normal(kw, (C, C), dtype=jnp.float32) * 0.5
    bias = jax.random.normal(kb, (C,), dtype=jnp.float32) * 0.1
    gamma_c = jax.random.normal(kgc, (B, C), dtype=jnp.float32) * 0.3
    beta_c = jax.random.normal(kbc, (B, C), dtype=jnp.float32) * 0.3
    gamma_u = jax.random.normal(kgu, (C,), dtype=jnp.float32) * 0.3
    beta_u = jax.random.normal(kbu, (C,), dtype=jnp.float32) * 0.3

    out = cfg_denoiser_for_glid(x, sigma, cond_scale, w, bias,
                                gamma_c, beta_c, gamma_u, beta_u)
    jax.block_until_ready(out)

    ref = _reference(x, sigma, cond_scale, w, bias,
                     gamma_c, beta_c, gamma_u, beta_u)
    assert out.shape == (B, C, H, W)
    assert jnp.allclose(out, ref, atol=1e-4, rtol=1e-4)

    print("KERNEL_OK")
</pallas_src>

<mosaic_0001>
module attributes {stable_mosaic.version = 11 : i64} {
  func.func @cfg_denoiser_kernel(%arg0: i32, %arg1: i32, %arg2: memref<32xf32, #tpu.memory_space<smem>>, %arg3: memref<8xf32, #tpu.memory_space<smem>>, %arg4: memref<1x4x8x128xf32, #tpu.memory_space<vmem>>, %arg5: memref<1x4x8x128xf32, #tpu.memory_space<vmem>>) attributes {dimension_semantics = [#tpu.dimension_semantics<parallel>, #tpu.dimension_semantics<parallel>], iteration_bounds = array<i64: 2, 1>, scalar_prefetch = 2 : i64, scratch_operands = 0 : i64, tpu.core_type = #tpu.core_type<tc>, window_params = [{transform_indices = @transform_0, window_bounds = array<i64: 1, 4, 8, 128>}, {transform_indices = @transform_1, window_bounds = array<i64: 1, 4, 8, 128>}]} {
    %c4_i32 = arith.constant 4 : i32
    %0 = arith.muli %arg0, %c4_i32 : i32
    %c4_i32_0 = arith.constant 4 : i32
    %1 = arith.muli %0, %c4_i32_0 : i32
    %c4_i32_1 = arith.constant 4 : i32
    %2 = arith.muli %arg0, %c4_i32_1 : i32
    %c0 = arith.constant 0 : index
    %c0_2 = arith.constant 0 : index
    %c0_3 = arith.constant 0 : index
    %c0_4 = arith.constant 0 : index
    %3 = vector.load %arg4[%c0, %c0_2, %c0_3, %c0_4] : memref<1x4x8x128xf32, #tpu.memory_space<vmem>>, vector<1x1x8x128xf32>
    %4 = vector.shape_cast %3 : vector<1x1x8x128xf32> to vector<8x128xf32>
    %c0_5 = arith.constant 0 : index
    %c1 = arith.constant 1 : index
    %c0_6 = arith.constant 0 : index
    %c0_7 = arith.constant 0 : index
    %5 = vector.load %arg4[%c0_5, %c1, %c0_6, %c0_7] : memref<1x4x8x128xf32, #tpu.memory_space<vmem>>, vector<1x1x8x128xf32>
    %6 = vector.shape_cast %5 : vector<1x1x8x128xf32> to vector<8x128xf32>
    %c0_8 = arith.constant 0 : index
    %c2 = arith.constant 2 : index
    %c0_9 = arith.constant 0 : index
    %c0_10 = arith.constant 0 : index
    %7 = vector.load %arg4[%c0_8, %c2, %c0_9, %c0_10] : memref<1x4x8x128xf32, #tpu.memory_space<vmem>>, vector<1x1x8x128xf32>
    %8 = vector.shape_cast %7 : vector<1x1x8x128xf32> to vector<8x128xf32>
    %c0_11 = arith.constant 0 : index
    %c3 = arith.constant 3 : index
    %c0_12 = arith.constant 0 : index
    %c0_13 = arith.constant 0 : index
    %9 = vector.load %arg4[%c0_11, %c3, %c0_12, %c0_13] : memref<1x4x8x128xf32, #tpu.memory_space<vmem>>, vector<1x1x8x128xf32>
    %10 = vector.shape_cast %9 : vector<1x1x8x128xf32> to vector<8x128xf32>
    %c0_i32 = arith.constant 0 : i32
    %11 = arith.addi %1, %c0_i32 : i32
    %12 = arith.index_cast %11 : i32 to index
    %13 = memref.load %arg2[%12] : memref<32xf32, #tpu.memory_space<smem>>
    %14 = vector.broadcast %13 : f32 to vector<8x128xf32>
    %15 = arith.mulf %4, %14 : vector<8x128xf32>
    %c4_i32_14 = arith.constant 4 : i32
    %16 = arith.addi %1, %c4_i32_14 : i32
    %c0_i32_15 = arith.constant 0 : i32
    %17 = arith.addi %16, %c0_i32_15 : i32
    %18 = arith.index_cast %17 : i32 to index
    %19 = memref.load %arg2[%18] : memref<32xf32, #tpu.memory_space<smem>>
    %20 = vector.broadcast %19 : f32 to vector<8x128xf32>
    %21 = arith.mulf %6, %20 : vector<8x128xf32>
    %22 = arith.addf %15, %21 : vector<8x128xf32>
    %c8_i32 = arith.constant 8 : i32
    %23 = arith.addi %1, %c8_i32 : i32
    %c0_i32_16 = arith.constant 0 : i32
    %24 = arith.addi %23, %c0_i32_16 : i32
    %25 = arith.index_cast %24 : i32 to index
    %26 = memref.load %arg2[%25] : memref<32xf32, #tpu.memory_space<smem>>
    %27 = vector.broadcast %26 : f32 to vector<8x128xf32>
    %28 = arith.mulf %8, %27 : vector<8x128xf32>
    %29 = arith.addf %22, %28 : vector<8x128xf32>
    %c12_i32 = arith.constant 12 : i32
    %30 = arith.addi %1, %c12_i32 : i32
    %c0_i32_17 = arith.constant 0 : i32
    %31 = arith.addi %30, %c0_i32_17 : i32
    %32 = arith.index_cast %31 : i32 to index
    %33 = memref.load %arg2[%32] : memref<32xf32, #tpu.memory_space<smem>>
    %34 = vector.broadcast %33 : f32 to vector<8x128xf32>
    %35 = arith.mulf %10, %34 : vector<8x128xf32>
    %36 = arith.addf %29, %35 : vector<8x128xf32>
    %c0_i32_18 = arith.constant 0 : i32
    %37 = arith.addi %2, %c0_i32_18 : i32
    %38 = arith.index_cast %37 : i32 to index
    %39 = memref.load %arg3[%38] : memref<8xf32, #tpu.memory_space<smem>>
    %40 = vector.broadcast %39 : f32 to vector<8x128xf32>
    %41 = arith.addf %36, %40 : vector<8x128xf32>
    %c0_19 = arith.constant 0 : index
    %c0_20 = arith.constant 0 : index
    %c0_21 = arith.constant 0 : index
    %c0_22 = arith.constant 0 : index
    %42 = vector.load %arg5[%c0_19, %c0_20, %c0_21, %c0_22] : memref<1x4x8x128xf32, #tpu.memory_space<vmem>>, vector<1x1x8x128xf32>
    %43 = vector.shape_cast %42 : vector<1x1x8x128xf32> to vector<8x128xf32>
    %44 = vector.shape_cast %41 : vector<8x128xf32> to vector<1x1x8x128xf32>
    tpu.vector_store %arg5[%c0_19, %c0_20, %c0_21, %c0_22], %44 {strides = array<i32>} : memref<1x4x8x128xf32, #tpu.memory_space<vmem>>, vector<1x1x8x128xf32>,
    %c1_i32 = arith.constant 1 : i32
    %45 = arith.addi %1, %c1_i32 : i32
    %46 = arith.index_cast %45 : i32 to index
    %47 = memref.load %arg2[%46] : memref<32xf32, #tpu.memory_space<smem>>
    %48 = vector.broadcast %47 : f32 to vector<8x128xf32>
    %49 = arith.mulf %4, %48 : vector<8x128xf32>
    %c4_i32_23 = arith.constant 4 : i32
    %50 = arith.addi %1, %c4_i32_23 : i32
    %c1_i32_24 = arith.constant 1 : i32
    %51 = arith.addi %50, %c1_i32_24 : i32
    %52 = arith.index_cast %51 : i32 to index
    %53 = memref.load %arg2[%52] : memref<32xf32, #tpu.memory_space<smem>>
    %54 = vector.broadcast %53 : f32 to vector<8x128xf32>
    %55 = arith.mulf %6, %54 : vector<8x128xf32>
    %56 = arith.addf %49, %55 : vector<8x128xf32>
    %c8_i32_25 = arith.constant 8 : i32
    %57 = arith.addi %1, %c8_i32_25 : i32
    %c1_i32_26 = arith.constant 1 : i32
    %58 = arith.addi %57, %c1_i32_26 : i32
    %59 = arith.index_cast %58 : i32 to index
    %60 = memref.load %arg2[%59] : memref<32xf32, #tpu.memory_space<smem>>
    %61 = vector.broadcast %60 : f32 to vector<8x128xf32>
    %62 = arith.mulf %8, %61 : vector<8x128xf32>
    %63 = arith.addf %56, %62 : vector<8x128xf32>
    %c12_i32_27 = arith.constant 12 : i32
    %64 = arith.addi %1, %c12_i32_27 : i32
    %c1_i32_28 = arith.constant 1 : i32
    %65 = arith.addi %64, %c1_i32_28 : i32
    %66 = arith.index_cast %65 : i32 to index
    %67 = memref.load %arg2[%66] : memref<32xf32, #tpu.memory_space<smem>>
    %68 = vector.broadcast %67 : f32 to vector<8x128xf32>
    %69 = arith.mulf %10, %68 : vector<8x128xf32>
    %70 = arith.addf %63, %69 : vector<8x128xf32>
    %c1_i32_29 = arith.constant 1 : i32
    %71 = arith.addi %2, %c1_i32_29 : i32
    %72 = arith.index_cast %71 : i32 to index
    %73 = memref.load %arg3[%72] : memref<8xf32, #tpu.memory_space<smem>>
    %74 = vector.broadcast %73 : f32 to vector<8x128xf32>
    %75 = arith.addf %70, %74 : vector<8x128xf32>
    %c0_30 = arith.constant 0 : index
    %c1_31 = arith.constant 1 : index
    %c0_32 = arith.constant 0 : index
    %c0_33 = arith.constant 0 : index
    %76 = vector.load %arg5[%c0_30, %c1_31, %c0_32, %c0_33] : memref<1x4x8x128xf32, #tpu.memory_space<vmem>>, vector<1x1x8x128xf32>
    %77 = vector.shape_cast %76 : vector<1x1x8x128xf32> to vector<8x128xf32>
    %78 = vector.shape_cast %75 : vector<8x128xf32> to vector<1x1x8x128xf32>
    tpu.vector_store %arg5[%c0_30, %c1_31, %c0_32, %c0_33], %78 {strides = array<i32>} : memref<1x4x8x128xf32, #tpu.memory_space<vmem>>, vector<1x1x8x128xf32>,
    %c2_i32 = arith.constant 2 : i32
    %79 = arith.addi %1, %c2_i32 : i32
    %80 = arith.index_cast %79 : i32 to index
    %81 = memref.load %arg2[%80] : memref<32xf32, #tpu.memory_space<smem>>
    %82 = vector.broadcast %81 : f32 to vector<8x128xf32>
    %83 = arith.mulf %4, %82 : vector<8x128xf32>
    %c4_i32_34 = arith.constant 4 : i32
    %84 = arith.addi %1, %c4_i32_34 : i32
    %c2_i32_35 = arith.constant 2 : i32
    %85 = arith.addi %84, %c2_i32_35 : i32
    %86 = arith.index_cast %85 : i32 to index
    %87 = memref.load %arg2[%86] : memref<32xf32, #tpu.memory_space<smem>>
    %88 = vector.broadcast %87 : f32 to vector<8x128xf32>
    %89 = arith.mulf %6, %88 : vector<8x128xf32>
    %90 = arith.addf %83, %89 : vector<8x128xf32>
    %c8_i32_36 = arith.constant 8 : i32
    %91 = arith.addi %1, %c8_i32_36 : i32
    %c2_i32_37 = arith.constant 2 : i32
    %92 = arith.addi %91, %c2_i32_37 : i32
    %93 = arith.index_cast %92 : i32 to index
    %94 = memref.load %arg2[%93] : memref<32xf32, #tpu.memory_space<smem>>
    %95 = vector.broadcast %94 : f32 to vector<8x128xf32>
    %96 = arith.mulf %8, %95 : vector<8x128xf32>
    %97 = arith.addf %90, %96 : vector<8x128xf32>
    %c12_i32_38 = arith.constant 12 : i32
    %98 = arith.addi %1, %c12_i32_38 : i32
    %c2_i32_39 = arith.constant 2 : i32
    %99 = arith.addi %98, %c2_i32_39 : i32
    %100 = arith.index_cast %99 : i32 to index
    %101 = memref.load %arg2[%100] : memref<32xf32, #tpu.memory_space<smem>>
    %102 = vector.broadcast %101 : f32 to vector<8x128xf32>
    %103 = arith.mulf %10, %102 : vector<8x128xf32>
    %104 = arith.addf %97, %103 : vector<8x128xf32>
    %c2_i32_40 = arith.constant 2 : i32
    %105 = arith.addi %2, %c2_i32_40 : i32
    %106 = arith.index_cast %105 : i32 to index
    %107 = memref.load %arg3[%106] : memref<8xf32, #tpu.memory_space<smem>>
    %108 = vector.broadcast %107 : f32 to vector<8x128xf32>
    %109 = arith.addf %104, %108 : vector<8x128xf32>
    %c0_41 = arith.constant 0 : index
    %c2_42 = arith.constant 2 : index
    %c0_43 = arith.constant 0 : index
    %c0_44 = arith.constant 0 : index
    %110 = vector.load %arg5[%c0_41, %c2_42, %c0_43, %c0_44] : memref<1x4x8x128xf32, #tpu.memory_space<vmem>>, vector<1x1x8x128xf32>
    %111 = vector.shape_cast %110 : vector<1x1x8x128xf32> to vector<8x128xf32>
    %112 = vector.shape_cast %109 : vector<8x128xf32> to vector<1x1x8x128xf32>
    tpu.vector_store %arg5[%c0_41, %c2_42, %c0_43, %c0_44], %112 {strides = array<i32>} : memref<1x4x8x128xf32, #tpu.memory_space<vmem>>, vector<1x1x8x128xf32>,
    %c3_i32 = arith.constant 3 : i32
    %113 = arith.addi %1, %c3_i32 : i32
    %114 = arith.index_cast %113 : i32 to index
    %115 = memref.load %arg2[%114] : memref<32xf32, #tpu.memory_space<smem>>
    %116 = vector.broadcast %115 : f32 to vector<8x128xf32>
    %117 = arith.mulf %4, %116 : vector<8x128xf32>
    %c4_i32_45 = arith.constant 4 : i32
    %118 = arith.addi %1, %c4_i32_45 : i32
    %c3_i32_46 = arith.constant 3 : i32
    %119 = arith.addi %118, %c3_i32_46 : i32
    %120 = arith.index_cast %119 : i32 to index
    %121 = memref.load %arg2[%120] : memref<32xf32, #tpu.memory_space<smem>>
    %122 = vector.broadcast %121 : f32 to vector<8x128xf32>
    %123 = arith.mulf %6, %122 : vector<8x128xf32>
    %124 = arith.addf %117, %123 : vector<8x128xf32>
    %c8_i32_47 = arith.constant 8 : i32
    %125 = arith.addi %1, %c8_i32_47 : i32
    %c3_i32_48 = arith.constant 3 : i32
    %126 = arith.addi %125, %c3_i32_48 : i32
    %127 = arith.index_cast %126 : i32 to index
    %128 = memref.load %arg2[%127] : memref<32xf32, #tpu.memory_space<smem>>
    %129 = vector.broadcast %128 : f32 to vector<8x128xf32>
    %130 = arith.mulf %8, %129 : vector<8x128xf32>
    %131 = arith.addf %124, %130 : vector<8x128xf32>
    %c12_i32_49 = arith.constant 12 : i32
    %132 = arith.addi %1, %c12_i32_49 : i32
    %c3_i32_50 = arith.constant 3 : i32
    %133 = arith.addi %132, %c3_i32_50 : i32
    %134 = arith.index_cast %133 : i32 to index
    %135 = memref.load %arg2[%134] : memref<32xf32, #tpu.memory_space<smem>>
    %136 = vector.broadcast %135 : f32 to vector<8x128xf32>
    %137 = arith.mulf %10, %136 : vector<8x128xf32>
    %138 = arith.addf %131, %137 : vector<8x128xf32>
    %c3_i32_51 = arith.constant 3 : i32
    %139 = arith.addi %2, %c3_i32_51 : i32
    %140 = arith.index_cast %139 : i32 to index
    %141 = memref.load %arg3[%140] : memref<8xf32, #tpu.memory_space<smem>>
    %142 = vector.broadcast %141 : f32 to vector<8x128xf32>
    %143 = arith.addf %138, %142 : vector<8x128xf32>
    %c0_52 = arith.constant 0 : index
    %c3_53 = arith.constant 3 : index
    %c0_54 = arith.constant 0 : index
    %c0_55 = arith.constant 0 : index
    %144 = vector.load %arg5[%c0_52, %c3_53, %c0_54, %c0_55] : memref<1x4x8x128xf32, #tpu.memory_space<vmem>>, vector<1x1x8x128xf32>
    %145 = vector.shape_cast %144 : vector<1x1x8x128xf32> to vector<8x128xf32>
    %146 = vector.shape_cast %143 : vector<8x128xf32> to vector<1x1x8x128xf32>
    tpu.vector_store %arg5[%c0_52, %c3_53, %c0_54, %c0_55], %146 {strides = array<i32>} : memref<1x4x8x128xf32, #tpu.memory_space<vmem>>, vector<1x1x8x128xf32>,
    return
  }
  func.func @transform_0(%arg0: i32, %arg1: i32, %arg2: memref<32xf32, #tpu.memory_space<smem>>, %arg3: memref<8xf32, #tpu.memory_space<smem>>) -> (i32, i32, i32, i32) {
    %c0_i32 = arith.constant 0 : i32
    %c0_i32_0 = arith.constant 0 : i32
    %c0_i32_1 = arith.constant 0 : i32
    return %arg0, %c0_i32, %arg1, %c0_i32_0 : i32, i32, i32, i32
  }
  func.func @transform_1(%arg0: i32, %arg1: i32, %arg2: memref<32xf32, #tpu.memory_space<smem>>, %arg3: memref<8xf32, #tpu.memory_space<smem>>) -> (i32, i32, i32, i32) {
    %c0_i32 = arith.constant 0 : i32
    %c0_i32_0 = arith.constant 0 : i32
    %c0_i32_1 = arith.constant 0 : i32
    return %arg0, %c0_i32, %arg1, %c0_i32_0 : i32, i32, i32, i32
  }
}

</mosaic_0001>

<bundles_post_ra>
// kernel: tpu_custom_call.1
= control target key start
LH: loop header
LB: loop body
LE: loop exit
PB: predicated region body
PF: predicated region fallthrough
CT: control target
= control target key end

     0   :  { %s901_s0 = inlined_call_operand.hbm [shape: f32[32], index: 0, kind: input, shape index: {}]   ;;  %s902_s2 = inlined_call_operand.hbm [shape: f32[2,4,8,128], index: 2, kind: input, shape index: {}]   ;;  %s903_s3 = inlined_call_operand.hbm [shape: f32[2,4,8,128], index: 3, kind: output, shape index: {}]   ;;  %s904_s1 = inlined_call_operand.hbm [shape: f32[8], index: 1, kind: input, shape index: {}]  }
   0x1   :  { %s459_s14 = scalar_lea.hbm %s901_s0, 16 }
   0x2   :  { %p460_p0 = scmp.ne.s32.totalorder %s901_s0, %s459_s14  ;;  %p463_p1 = scmp.lt.u32.totalorder %s459_s14, %s901_s0 }
   0x4   :  { %p465_p2 = pnand %p463_p1, %p460_p0 }
   0x6   :  { %468 = shalt.err (!%p465_p2)  }
   0x7   :  { %s595_s19 = smov [#allocation3]   ;;  %s469_s24 = scalar_lea.hbm %s904_s1, 16 }
   0x8   :  { %9 = dma.hbm_to_smem %s901_s0, 16, %s595_s19, [#allocation2] }
   0x9   :  { %p470_p3 = scmp.ne.s32.totalorder %s904_s1, %s469_s24  ;;  %p473_p4 = scmp.lt.u32.totalorder %s469_s24, %s904_s1 }
   0xb   :  { %p475_p5 = pnand %p473_p4, %p470_p3 }
   0xd   :  { %478 = shalt.err (!%p475_p5)  }
   0xe   :  { %s596_s29 = smov [#allocation4]  }
   0xf   :  { %11 = dma.hbm_to_smem %s904_s1, 16, %s596_s29, [#allocation2] }
  0x10   :  { %561 = dma.done.wait [#allocation2], 32 }
  0x11   :  { %562 = vsyncadd [#allocation2], 4294967264 }
  0x12   :  { %13 = sfence }
  0x13   :  { %14 = vsyncpa [#allocation6], 0 }
  0x14   :  { %16 = vsyncpa [#allocation6 + $0x1], 0 }
  0x15   :  { %17 = vsyncpa [#allocation7], 0 }
  0x16   :  { %19 = vsyncpa [#allocation7 + $0x1], 0  ;;  %s647_s0 = smov 0   ;;  %s649_s5 = smov 0  }
  0x17   :  { %s651_s6 = smov 0   ;;  %s653_s7 = smov 0  }
  0x18   :  { %s655_s8 = smov 0   ;;  %s657_s9 = smov 0  }
  0x19 LB: > { %s366_s1 = sadd.s32 4294967295, %s593_s9   ;;  %s367_s10 = sadd.s32 4294967294, %s593_s9   ;;  %s593_s9 = sphi %s657_s9, %s25_s9   ;;  %s589_s8 = sphi %s655_s8, %s919_s8   ;;  %s585_s7 = sphi %s653_s7, %s918_s7   ;;  %s581_s6 = sphi %s651_s6, %s917_s6   ;;  %s577_s5 = sphi %s649_s5, %s916_s5   ;;  %s573_s0 = sphi %s647_s0, %s915_s0  }
  0x1a   : > { %s37_s11 = sadd.s32 1, %s589_s8  ;;  %s46_s12 = sadd.s32 1, %s581_s6 }
  0x1b   : > { %p39_p6 = scmp.ge.s32.totalorder %s37_s11, 2  ;;  %p53_p7 = scmp.ne.s32.totalorder %s581_s6, %s577_s5 }
  0x1c   : > { %p54_p8 = scmp.eq.s32.totalorder %s593_s9, 0  ;;  %p59_p9 = scmp.ne.s32.totalorder %s577_s5, %s573_s0 }
  0x1d   : > { %s921_s11 = smov (%p39_p6, %s37_s11), 0  ;;  %p60_p11 = scmp.eq.s32.totalorder %s366_s1, 0 }
  0x1e   : > { %p688_p10 = por %p54_p8, %p53_p7  ;;  %s41_s14 = ssub.s32 %s589_s8, %s921_s11 }
  0x1f   : > { %p85_p12 = scmp.eq.s32.totalorder %s366_s1, 1  ;;  %p44_p13 = scmp.eq.s32.totalorder %s41_s14, 0 }
  0x20   : > { %p694_p0 = por %p60_p11, %p59_p9  ;;  %p91_p2 = scmp.eq.s32.totalorder %s367_s10, 1 }
  0x21   : > { %p698_p1 = por %p85_p12, %p53_p7  ;;  %p403_p5 = scmp.lt.s32.totalorder %s593_s9, 2 }
  0x22   : > { %s703_s17 = scalar_select %p44_p13, %s581_s6, %s46_s12  }
  0x23   : > { %s908_s16 = scalar_select %p698_p1, 1, 0 }
  0x24   : > { %p705_p3 = por %p91_p2, %p59_p9  ;;  %s111_s19 = sand.u32 1, %s581_s6  }
  0x25   : > { %s370_s20 = sshll.u32 %s111_s19, 5  ;;  %s389_s21 = sshll.u32 %s589_s8, 9 }
  0x26   : > { %s909_s18 = scalar_select %p705_p3, 1, 0 }
  0x27   : > { %s716_s24 = scalar_lea.hbm %s902_s2, %s389_s21  ;;  %s115_s25 = scalar_lea.vmem [#allocation5], %s370_s20 }
  0x28   : > { %s123_s26 = sshll.u32 %s115_s25, 4  ;;  %p722_p6 = pnand %p403_p5, %p688_p10  ;;  %s718_s26 = int_to_ptr.vmem [resolvable:$true] %s123_s26 }
  0x29   : > { %s727_s28 = scalar_lea.sflag [#allocation6], %s111_s19  ;;  %s479_s29 = scalar_lea.hbm %s716_s24, 512 }
  0x2a   : > { %p480_p8 = scmp.ne.s32.totalorder %s716_s24, %s479_s29  ;;  %p481_p9 = pneg %p722_p6 }
  0x2b   : > { %s484_s1 = scalar_lea.hbm %s902_s2, 1024  ;;  %p485_p10 = scmp.lt.u32.totalorder %s716_s24, %s902_s2 }
  0x2c   : > { %p482_p11 = pnand %p481_p9, %p480_p8  ;;  %p486_p13 = scmp.lt.u32.totalorder %s484_s1, %s479_s29 }
  0x2d   : > { %p488_p5 = scmp.lt.u32.totalorder %s479_s29, %s716_s24 }
  0x2e   : > { %p483_p12 = pneg %p482_p11  ;;  %p487_p2 = por %p486_p13, %p485_p10 }
  0x30   : > { %p489_p4 = por %p488_p5, %p487_p2 }
  0x32   : > { %p490_p7 = pnand %p489_p4, %p483_p12 }
  0x34   : > { %493 = shalt.err (!%p490_p7)
}
  0x35   : > { %s494_s13 = scalar_lea.vmem %s718_s26, 512  ;;  %s597_s14 = smov [#allocation5]  }
  0x36   : > { %p495_p8 = scmp.ne.s32.totalorder %s718_s26, %s494_s13  ;;  %s499_s19 = sshll.u32 %s597_s14, 4  ;;  %s500_s19 = int_to_ptr.vmem [resolvable:$false] %s499_s19 }
  0x37   : > { %s501_s20 = scalar_lea.vmem %s500_s19, 1024  ;;  %p502_p1 = scmp.lt.s32.totalorder %s718_s26, %s500_s19 }
  0x38   : > { %p497_p11 = pnand %p495_p8, %p481_p9  ;;  %p503_p10 = scmp.lt.s32.totalorder %s501_s20, %s494_s13 }
  0x3a   : > { %p498_p3 = pneg %p497_p11  ;;  %p504_p13 = por %p503_p10, %p502_p1 }
  0x3c   : > { %p505_p2 = pnand %p504_p13, %p498_p3 }
  0x3e   : > { %508 = shalt.err (!%p505_p2)
}
  0x3f   : > { %s598_s21 = smov 128   ;;  %s599_s22 = smov 8  }
  0x40   : > { %398 = dma.hbm_to_vmem [thread:$0]  (!%p722_p6), %s716_s24, 512, %s718_s26, %s727_s28, %s598_s21, %s598_s21, %s599_s22  }
  0x41   : > { %p131_p4 = scmp.lt.s32.totalorder %s593_s9, 3  ;;  %p911_p7 = scmp.ge.s32.totalorder %s593_s9, 1 }
  0x43   : > { %p132_p9 = pnand %p911_p7, %p131_p4 }
  0x44   : > { %s759_s23 = sand.u32 (!%p132_p9), 1, %s577_s5  }
  0x45   : > { %135 = sbr.rel (%p132_p9) target bundleno = 126 (0x7e), region = 24  ;;  %s374_s25 = sshll.u32 (!%p132_p9), %s759_s23, 5 }
  0x46   : > { %s138_s29 = scalar_lea.sflag (!%p132_p9), [#allocation6], %s759_s23  ;;  %s141_s30 = scalar_lea.vmem (!%p132_p9), [#allocation5], %s374_s25 }
  0x4c   : > { %564 = dma.done.wait (%p694_p0), %s138_s29, 512  }
  0x4d   : > { %566 = vsyncadd (%p694_p0), %s138_s29, 4294966784  ;;  %s770_s24 = sshll.u32 %s585_s7, 4  ;;  %s773_s26 = sshll.u32 %s585_s7, 2  ;;  %v783_v0 = vld [vmem:[%s141_s30] sm:$0xff]  ;;  %v785_v1 = vld [vmem:[%s141_s30 + $0x8] sm:$0xff] }
  0x4e   : > { %s169_s27 = sld [smem:[#allocation3 + %s770_s24]]  ;;  %s172_s28 = sadd.s32 4, %s770_s24  ;;  %v787_v2 = vld [vmem:[%s141_s30 + $0x10] sm:$0xff]  ;;  %v792_v5 = vld [vmem:[%s141_s30 + $0x18] sm:$0xff] }
  0x4f   : > { %s177_s4 = sadd.s32 8, %s770_s24  ;;  %s173_s1 = sld [smem:[#allocation3 + %s172_s28]] }
  0x50   : > { %s178_s15 = sld [smem:[#allocation3 + %s177_s4]]  ;;  %s182_s10 = sadd.s32 12, %s770_s24 }
  0x51   : > { %s183_s12 = sld [smem:[#allocation3 + %s182_s10]]  ;;  %s191_s14 = sadd.s32 1, %s770_s24 }
  0x52   : > { %s780_s13 = sld [smem:[#allocation4 + %s773_s26]]  ;;  %s195_s20 = sadd.s32 5, %s770_s24 }
  0x53   : > { %s192_s19 = sld [smem:[#allocation3 + %s191_s14]]  ;;  %s200_s22 = sadd.s32 9, %s770_s24 }
  0x54   : > { %v170_v3 = vstv %s169_s27  ;;  %s196_s21 = sld [smem:[#allocation3 + %s195_s20]]  ;;  %s205_s28 = sadd.s32 13, %s770_s24 }
  0x55   : > { %v171_v4 = vmul.f32 %v170_v3, %v783_v0  ;;  %v174_v6 = vstv %s173_s1  ;;  %s201_s29 = sld [smem:[#allocation3 + %s200_s22]]  ;;  %s210_s4 = sadd.s32 1, %s773_s26 }
  0x56   : > { %v179_v7 = vstv %s178_s15  ;;  %v175_v8 = vmul.f32 %v785_v1, %v174_v6  ;;  %s206_s27 = sld [smem:[#allocation3 + %s205_s28]]  ;;  %s216_s14 = sadd.s32 2, %s770_s24 }
  0x57   : > { %v180_v9 = vmul.f32 %v787_v2, %v179_v7  ;;  %v184_v10 = vstv %s183_s12  ;;  %s798_s10 = sld [smem:[#allocation4 + %s210_s4]]  ;;  %s220_s1 = sadd.s32 6, %s770_s24 }
  0x58   : > { %v176_v11 = vadd.f32 %v175_v8, %v171_v4  ;;  %v185_v12 = vmul.f32 %v792_v5, %v184_v10  ;;  %s217_s30 = sld [smem:[#allocation3 + %s216_s14]]  ;;  %s225_s20 = sadd.s32 10, %s770_s24  ;;  %v188_v17 = vstv %s780_s13 }
  0x59   : > { %v193_v13 = vstv %s192_s19  ;;  %s803_s15 = sld [smem:[#allocation3 + %s220_s1]]  ;;  %s230_s22 = sadd.s32 14, %s770_s24 }
  0x5a   : > { %v181_v14 = vadd.f32 %v180_v9, %v176_v11  ;;  %v194_v15 = vmul.f32 %v193_v13, %v783_v0  ;;  %v197_v16 = vstv %s196_s21  ;;  %s807_s12 = sld [smem:[#allocation3 + %s225_s20]]  ;;  %s235_s19 = sadd.s32 2, %s773_s26 }
  0x5b   : > { %v198_v18 = vmul.f32 %v785_v1, %v197_v16  ;;  %v202_v19 = vstv %s201_s29  ;;  %s812_s28 = sld [smem:[#allocation3 + %s230_s22]]  ;;  %s241_s4 = sadd.s32 3, %s770_s24 }
  0x5c   : > { %v186_v20 = vadd.f32 %v185_v12, %v181_v14  ;;  %v203_v21 = vmul.f32 %v787_v2, %v202_v19  ;;  %v207_v22 = vstv %s206_s27  ;;  %s816_s21 = sld [smem:[#allocation4 + %s235_s19]]  ;;  %s245_s29 = sadd.s32 7, %s770_s24 }
  0x5d   : > { %v199_v23 = vadd.f32 %v198_v18, %v194_v15  ;;  %v208_v24 = vmul.f32 %v792_v5, %v207_v22  ;;  %s242_s13 = sld [smem:[#allocation3 + %s241_s4]]  ;;  %s250_s1 = sadd.s32 11, %s770_s24  ;;  %v212_v30 = vstv %s798_s10 }
  0x5e   : > { %v189_v25 = vadd.f32 %v188_v17, %v186_v20  ;;  %v218_v26 = vstv %s217_s30  ;;  %s246_s14 = sld [smem:[#allocation3 + %s245_s29]]  ;;  %s255_s20 = sadd.s32 15, %s770_s24 }
  0x5f   : > { %v204_v27 = vadd.f32 %v203_v21, %v199_v23  ;;  %v219_v28 = vmul.f32 %v218_v26, %v783_v0  ;;  %v222_v29 = vstv %s803_s15  ;;  %s251_s27 = sld [smem:[#allocation3 + %s250_s1]]  ;;  %s827_s22 = scalar_lea.vmem [#allocation8], %s374_s25 }
  0x60   : > { %190 = vst [vmem:[%s827_s22] sm:$0xff] %v189_v25  ;;  %v223_v31 = vmul.f32 %v785_v1, %v222_v29  ;;  %v227_v32 = vstv %s807_s12  ;;  %s256_s30 = sld [smem:[#allocation3 + %s255_s20]]  ;;  %s260_s19 = sadd.s32 3, %s773_s26 }
  0x61   : > { %v209_v33 = vadd.f32 %v208_v24, %v204_v27  ;;  %v228_v34 = vmul.f32 %v787_v2, %v227_v32  ;;  %v232_v35 = vstv %s812_s28  ;;  %s261_s25 = sld [smem:[#allocation4 + %s260_s19]]  ;;  %s281_s24 = sshll.u32 %s827_s22, 4  ;;  %s846_s24 = int_to_ptr.vmem [resolvable:$true] %s281_s24 }
  0x62   : > { %v224_v36 = vadd.f32 %v223_v31, %v219_v28  ;;  %v233_v37 = vmul.f32 %v792_v5, %v232_v35  ;;  %v237_v43 = vstv %s816_s21  ;;  %s390_s26 = sshll.u32 %s585_s7, 9  ;;  %s267_s28 = scalar_lea.sflag [#allocation7], %s759_s23 }
  0x63   : > { %v213_v38 = vadd.f32 %v212_v30, %v209_v33  ;;  %v243_v39 = vstv %s242_s13  ;;  %s851_s12 = scalar_lea.hbm %s903_s3, %s390_s26  ;;  %s509_s21 = scalar_lea.vmem %s846_s24, 512 }
  0x64   : > { %v229_v40 = vadd.f32 %v228_v34, %v224_v36  ;;  %v244_v41 = vmul.f32 %v243_v39, %v783_v0  ;;  %v247_v42 = vstv %s246_s14  ;;  %p510_p0 = scmp.ne.s32.totalorder %s846_s24, %s509_s21  ;;  %p912_p1 = scmp.ne.s32.totalorder %s908_s16, 0 }
  0x65   : > { %381 = vst [vmem:[%s827_s22 + $0x8] sm:$0xff] %v213_v38  ;;  %v248_v44 = vmul.f32 %v785_v1, %v247_v42  ;;  %v252_v45 = vstv %s251_s27  ;;  %s600_s7 = smov [#allocation8]  }
  0x66   : > { %v234_v46 = vadd.f32 %v233_v37, %v229_v40  ;;  %v253_v47 = vmul.f32 %v787_v2, %v252_v45  ;;  %v257_v48 = vstv %s256_s30  ;;  %p511_p3 = pnand %p510_p0, %p912_p1  ;;  %s513_s4 = sshll.u32 %s600_s7, 4  ;;  %s514_s4 = int_to_ptr.vmem [resolvable:$false] %s513_s4 }
  0x67   : > { %v249_v49 = vadd.f32 %v248_v44, %v244_v41  ;;  %v258_v50 = vmul.f32 %v792_v5, %v257_v48  ;;  %v262_v53 = vstv %s261_s25  ;;  %s515_s13 = scalar_lea.vmem %s514_s4, 1024  ;;  %p516_p12 = scmp.lt.s32.totalorder %s846_s24, %s514_s4 }
  0x68   : > { %v238_v51 = vadd.f32 %v237_v43, %v234_v46  ;;  %p512_p6 = pneg %p511_p3  ;;  %p517_p5 = scmp.lt.s32.totalorder %s515_s13, %s509_s21 }
  0x69   : > { %v254_v52 = vadd.f32 %v253_v47, %v249_v49 }
  0x6a   : > { %382 = vst [vmem:[%s827_s22 + $0x10] sm:$0xff] %v238_v51  ;;  %p518_p8 = por %p517_p5, %p516_p12 }
  0x6b   : > { %v259_v54 = vadd.f32 %v258_v50, %v254_v52 }
  0x6c   : > { %p519_p11 = pnand %p518_p8, %p512_p6 }
  0x6d   : > { %v263_v55 = vadd.f32 %v262_v53, %v259_v54 }
  0x6f   : > { %383 = vst [vmem:[%s827_s22 + $0x18] sm:$0xff] %v263_v55 }
  0x70   : > { %522 = shalt.err (!%p519_p11)
}
  0x71   : > { %s523_s29 = scalar_lea.hbm %s851_s12, 512  ;;  %s527_s27 = scalar_lea.hbm %s903_s3, 1024 }
  0x72   : > { %p524_p10 = scmp.ne.s32.totalorder %s851_s12, %s523_s29  ;;  %p528_p4 = scmp.lt.u32.totalorder %s851_s12, %s903_s3 }
  0x73   : > { %p529_p7 = scmp.lt.u32.totalorder %s527_s27, %s523_s29  ;;  %p531_p0 = scmp.lt.u32.totalorder %s523_s29, %s851_s12 }
  0x74   : > { %p525_p13 = pnand %p524_p10, %p912_p1 }
  0x75   : > { %p530_p9 = por %p529_p7, %p528_p4 }
  0x76   : > { %p526_p2 = pneg %p525_p13 }
  0x77   : > { %p532_p3 = por %p531_p0, %p530_p9 }
  0x79   : > { %p533_p6 = pnand %p532_p3, %p526_p2 }
  0x7b   : > { %536 = shalt.err (!%p533_p6)
}
  0x7c   : > { %s601_s30 = smov 128   ;;  %s602_s19 = smov 8  }
  0x7d   : > { %393 = dma.vmem_to_hbm [thread:$0]  (%p912_p1), %s846_s24, 512, %s851_s12, %s267_s28, %s601_s30, %s601_s30, %s602_s19  }
  0x7e PF: > { %s296_s25 = sand.u32 1, %s573_s0   ;;  %p913_p12 = scmp.ne.s32.totalorder %s909_s18, 0 }
  0x7f   : > { %p914_p5 = scmp.ge.s32.totalorder %s593_s9, 2  ;;  %s297_s26 = scalar_lea.sflag [#allocation7], %s296_s25 }
  0x81   : > { %p400_p8 = pnand %p914_p5, %p913_p12 }
  0x83   : > { %568 = dma.done.wait (!%p400_p8), %s297_s26, 512  }
  0x84   : > { %570 = vsyncadd (!%p400_p8), %s297_s26, 4294966784  ;;  %s25_s9 = sadd.s32 1, %s593_s9   ;;  %s915_s0 = smov %s577_s5 }
  0x85   : > { %p22_p11 = scmp.ge.s32.totalorder %s25_s9, 4   ;;  %s916_s5 = smov %s581_s6 }
  0x86   : > { %s917_s6 = smov %s703_s17  ;;  %s918_s7 = smov %s589_s8 }
  0x87   : > { %s919_s8 = smov %s921_s11  ;;  %24 = sbr.rel (!%p22_p11) target bundleno = 25 (0x19), region = 75 }
  0x8e   :  { %302 = vsyncpa [#allocation6], 1 }
  0x8f   :  { %304 = vsyncpa [#allocation6 + $0x1], 1 }
  0x90   :  { %305 = vsyncpa [#allocation7], 1 }
  0x91   :  { %307 = vsyncpa [#allocation7 + $0x1], 1 }

</bundles_post_ra>
